<compile_context>
chip_gen: v6e
topology: v6e:2x2x1
jax: 0.10.0
libtpu: 0.0.40
codegen_flags: <defaults>
</compile_context>

<pallas_src>
import functools

import jax
import jax.numpy as jnp
from jax.experimental import pallas as pl
from jax.experimental.pallas import tpu as pltpu

# TODO(synk): CLIP ViT-B/32 text encoder (model.encode_text) is a pretrained
# checkpoint-backed module with no clean in-script Pallas equivalent; its
# outputs are synthesized as random bf16 features of the correct shape.

CLIP_WIDTH = 512   # CLIP ViT-B/32 text transformer width (fixed by the module)
_LANE = 128        # TPU lane width; output dim padded to a multiple of this
_TM = 512          # row tile for the lang path once B*T grows large


def _round_up(x, m):
    return ((x + m - 1) // m) * m


def _fused_proj_kernel(lang_x_ref, eot_x_ref, lang_w_ref, lang_b_ref,
                       eot_w_ref, eot_b_ref, lang_o_ref, eot_o_ref):
    """out = x @ W + b for the lang AND eot projections in one kernel body.

    Activations arrive in their storage dtype (bf16 from CLIP) and are upcast
    in-kernel (mirrors `.float()` in the PyTorch module); matmuls accumulate
    in f32 on the MXU and the bias-add / store epilogue stays f32 (v5e-safe:
    no bf16 VPU math required).
    """
    lang_x = lang_x_ref[...].astype(jnp.float32)
    lang_o_ref[...] = (
        jnp.dot(lang_x, lang_w_ref[...], preferred_element_type=jnp.float32)
        + lang_b_ref[...])

    # The eot projection is tiny ([B, 512] @ [512, Npad]); recomputing and
    # rewriting it on every grid step is idempotent and negligible, so this
    # same body is valid for both the un-gridded and the M-tiled call below.
    eot_x = eot_x_ref[...].astype(jnp.float32)
    eot_o_ref[...] = (
        jnp.dot(eot_x, eot_w_ref[...], preferred_element_type=jnp.float32)
        + eot_b_ref[...])


@functools.partial(jax.jit, static_argnums=(6,))
def clip_fused_projection(lang_x, eot_x, lang_w, lang_b, eot_w, eot_b, n_out):
    """Fused lang/eot linear projections.

    lang_x: [M1, K] (bf16 or f32), eot_x: [M2, K]
    lang_w/eot_w: [K, Npad] f32  (zero-padded so Npad is a multiple of 128)
    lang_b/eot_b: [1, Npad] f32
    Returns (lang_out [M1, n_out] f32, eot_out [M2, n_out] f32).
    """
    m1, k = lang_x.shape
    m2, k2 = eot_x.shape
    n_pad = lang_w.shape[1]
    assert k == k2 == lang_w.shape[0] == eot_w.shape[0]
    assert lang_b.shape == (1, n_pad) and eot_b.shape == (1, n_pad)

    if m1 <= _TM:
        # Small M: the whole problem fits comfortably in VMEM as full-array
        # blocks -> single pallas_call, no grid, no BlockSpec bookkeeping.
        lang_o, eot_o = pl.pallas_call(
            _fused_proj_kernel,
            out_shape=(jax.ShapeDtypeStruct((m1, n_pad), jnp.float32),
                       jax.ShapeDtypeStruct((m2, n_pad), jnp.float32)),
        )(lang_x, eot_x, lang_w, lang_b, eot_w, eot_b)
    else:
        # Realistic batch sizes: tile the lang rows (512-row tiles stay far
        # under even v7x's 64 MiB VMEM with double buffering), keep the
        # weights / biases / eot operands resident across the grid.
        m1p = _round_up(m1, _TM)
        if m1p != m1:
            lang_x = jnp.pad(lang_x, ((0, m1p - m1), (0, 0)))
        lang_o, eot_o = pl.pallas_call(
            _fused_proj_kernel,
            out_shape=(jax.ShapeDtypeStruct((m1p, n_pad), jnp.float32),
                       jax.ShapeDtypeStruct((m2, n_pad), jnp.float32)),
            grid=(m1p // _TM,),
            in_specs=[
                pl.BlockSpec((_TM, k), lambda i: (i, 0)),     # lang rows, tiled
                pl.BlockSpec((m2, k), lambda i: (0, 0)),      # eot rows, resident
                pl.BlockSpec((k, n_pad), lambda i: (0, 0)),   # lang_w resident
                pl.BlockSpec((1, n_pad), lambda i: (0, 0)),   # lang_b resident
                pl.BlockSpec((k, n_pad), lambda i: (0, 0)),   # eot_w resident
                pl.BlockSpec((1, n_pad), lambda i: (0, 0)),   # eot_b resident
            ],
            out_specs=(
                pl.BlockSpec((_TM, n_pad), lambda i: (i, 0)),
                pl.BlockSpec((m2, n_pad), lambda i: (0, 0)),
            ),
            compiler_params=pltpu.CompilerParams(
                # eot's output block index is constant across the M axis
                # (resident-output pattern) -> mark the axis "arbitrary".
                dimension_semantics=("arbitrary",),
            ),
        )(lang_x, eot_x, lang_w, lang_b, eot_w, eot_b)
        lang_o = lang_o[:m1]

    # Strip the lane padding back to the true output width (fused under jit).
    return lang_o[:, :n_out], eot_o[:, :n_out]


class ClipModuleJax:
    """JAX/Pallas port of ClipModule's trainable forward path."""

    def __init__(self, output_dim, key):
        self.output_dim = output_dim
        n_pad = _round_up(output_dim, _LANE)
        k1, k2, k3, k4 = jax.random.split(key, 4)
        # nn.Linear(512, output_dim) x 2; weights stored as [in, out].
        lim = 1.0 / jnp.sqrt(CLIP_WIDTH)
        self.lang_w = jax.random.uniform(
            k1, (CLIP_WIDTH, output_dim), jnp.float32, -lim, lim)
        self.lang_b = jax.random.uniform(
            k2, (output_dim,), jnp.float32, -lim, lim)
        self.eot_w = jax.random.uniform(
            k3, (CLIP_WIDTH, output_dim), jnp.float32, -lim, lim)
        self.eot_b = jax.random.uniform(
            k4, (output_dim,), jnp.float32, -lim, lim)
        # Lane-dense operand bundle for the fused kernel, built ONCE (not per
        # call): weights/biases zero-padded on the output axis to a multiple
        # of 128 and bias pre-shaped to (1, Npad).
        pad = n_pad - output_dim
        self.lang_w_pad = jnp.pad(self.lang_w, ((0, 0), (0, pad)))
        self.eot_w_pad = jnp.pad(self.eot_w, ((0, 0), (0, pad)))
        self.lang_b_pad = jnp.pad(self.lang_b.reshape(1, -1), ((0, 0), (0, pad)))
        self.eot_b_pad = jnp.pad(self.eot_b.reshape(1, -1), ((0, 0), (0, pad)))

    def __call__(self, data_dict):
        # Frozen CLIP text-encoder output (synthetic); stop_gradient mimics
        # torch.no_grad().  Features stay in their storage dtype (bf16) — the
        # `.float()` upcast happens inside the Pallas kernel, not as a wrapper
        # XLA convert op.
        lang_feat = jax.lax.stop_gradient(data_dict["lang_feat"])
        eot_feat = jax.lax.stop_gradient(data_dict["eot_feat"])

        b, t, c = lang_feat.shape
        lang_proj, eot_proj = clip_fused_projection(
            lang_feat.reshape(b * t, c), eot_feat,
            self.lang_w_pad, self.lang_b_pad,
            self.eot_w_pad, self.eot_b_pad,
            self.output_dim)

        data_dict["lang_emb"] = lang_proj.reshape(b, t, self.output_dim)
        data_dict["lang_hidden"] = eot_proj
        return data_dict


if __name__ == "__main__":
    key = jax.random.PRNGKey(0)
    k_feat, k_eot, k_params = jax.random.split(key, 3)

    B, T, output_dim = 2, 8, 32
    # Synthetic CLIP encode_text outputs (CLIP emits half precision; the torch
    # module then calls .float() — here that cast happens inside the kernel).
    lang_feat = jax.random.normal(k_feat, (B, T, CLIP_WIDTH), jnp.bfloat16)
    eot_feat = jax.random.normal(k_eot, (B, CLIP_WIDTH), jnp.bfloat16)

    module = ClipModuleJax(output_dim, k_params)
    data_dict = {"lang_feat": lang_feat, "eot_feat": eot_feat}
    out = module(data_dict)

    jax.block_until_ready(out["lang_emb"])
    jax.block_until_ready(out["lang_hidden"])

    # Sanity check against a plain JAX reference (same bf16-quantized inputs,
    # f32 weights).  Tolerance accounts for the MXU's bf16-pass emulation of
    # f32 matmuls possibly differing between the Pallas dot and XLA's dot.
    ref_lang = (lang_feat.astype(jnp.float32).reshape(B * T, CLIP_WIDTH)
                @ module.lang_w + module.lang_b).reshape(B, T, output_dim)
    ref_eot = eot_feat.astype(jnp.float32) @ module.eot_w + module.eot_b

    assert out["lang_emb"].shape == (B, T, output_dim)
    assert out["lang_hidden"].shape == (B, output_dim)
    assert out["lang_emb"].dtype == jnp.float32
    assert out["lang_hidden"].dtype == jnp.float32
    assert jnp.allclose(out["lang_emb"], ref_lang, atol=2e-2, rtol=2e-2)
    assert jnp.allclose(out["lang_hidden"], ref_eot, atol=2e-2, rtol=2e-2)

    print("KERNEL_OK")
</pallas_src>

<mosaic_0001>
module attributes {stable_mosaic.version = 11 : i64} {
  func.func @_fused_proj_kernel(%arg0: memref<16x512xbf16, #tpu.memory_space<vmem>>, %arg1: memref<2x512xbf16, #tpu.memory_space<vmem>>, %arg2: memref<512x128xf32, #tpu.memory_space<vmem>>, %arg3: memref<1x128xf32, #tpu.memory_space<vmem>>, %arg4: memref<512x128xf32, #tpu.memory_space<vmem>>, %arg5: memref<1x128xf32, #tpu.memory_space<vmem>>, %arg6: memref<16x128xf32, #tpu.memory_space<vmem>>, %arg7: memref<2x128xf32, #tpu.memory_space<vmem>>) attributes {dimension_semantics = [], scalar_prefetch = 0 : i64, scratch_operands = 0 : i64, tpu.core_type = #tpu.core_type<tc>} {
    %c0 = arith.constant 0 : index
    %c0_0 = arith.constant 0 : index
    %0 = vector.load %arg0[%c0, %c0_0] : memref<16x512xbf16, #tpu.memory_space<vmem>>, vector<16x512xbf16>
    %1 = arith.extf %0 : vector<16x512xbf16> to vector<16x512xf32>
    %c0_1 = arith.constant 0 : index
    %c0_2 = arith.constant 0 : index
    %2 = vector.load %arg2[%c0_1, %c0_2] : memref<512x128xf32, #tpu.memory_space<vmem>>, vector<512x128xf32>
    %cst = arith.constant dense<0.000000e+00> : vector<16x128xf32>
    %3 = tpu.matmul %1, %2, %cst {dimension_numbers = #tpu.dot_dimension_numbers<[1], [0], [0], [1], [0, 0, 1, 1], [], []>} : vector<16x512xf32>, vector<512x128xf32>, vector<16x128xf32> -> vector<16x128xf32>
    %c0_3 = arith.constant 0 : index
    %c0_4 = arith.constant 0 : index
    %4 = vector.load %arg3[%c0_3, %c0_4] : memref<1x128xf32, #tpu.memory_space<vmem>>, vector<1x128xf32>
    %5 = vector.broadcast %4 : vector<1x128xf32> to vector<16x128xf32>
    %6 = arith.addf %3, %5 : vector<16x128xf32>
    %c0_5 = arith.constant 0 : index
    %c0_6 = arith.constant 0 : index
    %7 = vector.load %arg6[%c0_5, %c0_6] : memref<16x128xf32, #tpu.memory_space<vmem>>, vector<16x128xf32>
    tpu.vector_store %arg6[%c0_5, %c0_6], %6 {strides = array<i32>} : memref<16x128xf32, #tpu.memory_space<vmem>>, vector<16x128xf32>,
    %c0_7 = arith.constant 0 : index
    %c0_8 = arith.constant 0 : index
    %8 = vector.load %arg1[%c0_7, %c0_8] : memref<2x512xbf16, #tpu.memory_space<vmem>>, vector<2x512xbf16>
    %9 = arith.extf %8 : vector<2x512xbf16> to vector<2x512xf32>
    %c0_9 = arith.constant 0 : index
    %c0_10 = arith.constant 0 : index
    %10 = vector.load %arg4[%c0_9, %c0_10] : memref<512x128xf32, #tpu.memory_space<vmem>>, vector<512x128xf32>
    %cst_11 = arith.constant dense<0.000000e+00> : vector<2x128xf32>
    %11 = tpu.matmul %9, %10, %cst_11 {dimension_numbers = #tpu.dot_dimension_numbers<[1], [0], [0], [1], [0, 0, 1, 1], [], []>} : vector<2x512xf32>, vector<512x128xf32>, vector<2x128xf32> -> vector<2x128xf32>
    %c0_12 = arith.constant 0 : index
    %c0_13 = arith.constant 0 : index
    %12 = vector.load %arg5[%c0_12, %c0_13] : memref<1x128xf32, #tpu.memory_space<vmem>>, vector<1x128xf32>
    %13 = vector.broadcast %12 : vector<1x128xf32> to vector<2x128xf32>
    %14 = arith.addf %11, %13 : vector<2x128xf32>
    %c0_14 = arith.constant 0 : index
    %c0_15 = arith.constant 0 : index
    %15 = vector.load %arg7[%c0_14, %c0_15] : memref<2x128xf32, #tpu.memory_space<vmem>>, vector<2x128xf32>
    tpu.vector_store %arg7[%c0_14, %c0_15], %14 {strides = array<i32>} : memref<2x128xf32, #tpu.memory_space<vmem>>, vector<2x128xf32>,
    return
  }
}

</mosaic_0001>

<bundles_post_ra>
// kernel: clip_fused_projection.1
= control target key start
LH: loop header
LB: loop body
LE: loop exit
PB: predicated region body
PF: predicated region fallthrough
CT: control target
= control target key end

     0   :  { %13 = vsyncpa [#allocation3], 0  ;;  %s957_s0 = inlined_call_operand.hbm [shape: bf16[16,512], index: 0, kind: input, shape index: {}]   ;;  %s958_s1 = inlined_call_operand.hbm [shape: bf16[2,512], index: 1, kind: input, shape index: {}]   ;;  %s959_s2 = inlined_call_operand.hbm [shape: f32[512,128], index: 2, kind: input, shape index: {}]   ;;  %s960_s3 = inlined_call_operand.vmem [shape: f32[1,128], index: 3, kind: input, shape index: {}]   ;;  %s961_s4 = inlined_call_operand.hbm [shape: f32[512,128], index: 4, kind: input, shape index: {}]   ;;  %s962_s5 = inlined_call_operand.vmem [shape: f32[1,128], index: 5, kind: input, shape index: {}]   ;;  %s963_s6 = inlined_call_operand.hbm [shape: f32[16,128], index: 6, kind: output, shape index: {0}]   ;;  %s964_s7 = inlined_call_operand.hbm [shape: f32[2,128], index: 7, kind: output, shape index: {1}]  }
   0x1   :  { %14 = vsyncpa [#allocation6], 0 }
   0x2   :  { %15 = vsyncpa [#allocation9], 0 }
   0x3   :  { %16 = vsyncpa [#allocation4], 0 }
   0x4   :  { %17 = vsyncpa [#allocation12], 0  ;;  %s873_s24 = smov [#allocation5]   ;;  %s874_s26 = smov [#allocation2]  }
   0x5   :  { %s36_s25 = sshll.u32 %s873_s24, 4  ;;  %s23_s27 = sshll.u32 %s874_s26, 4  ;;  %s37_s25 = int_to_ptr.vmem [resolvable:$true] %s36_s25  ;;  %s24_s27 = int_to_ptr.vmem [resolvable:$true] %s23_s27 }
   0x6   :  { %s751_s28 = scalar_lea.vmem %s37_s25, 64  ;;  %p756_p1 = scmp.lt.s32.totalorder %s37_s25, %s37_s25 }
   0x7   :  { %p752_p0 = scmp.ne.s32.totalorder %s37_s25, %s751_s28  ;;  %p757_p2 = scmp.lt.s32.totalorder %s751_s28, %s751_s28 }
   0x9   :  { %p758_p3 = por %p757_p2, %p756_p1 }
   0xb   :  { %p759_p4 = pnand %p758_p3, %p752_p0 }
   0xd   :  { %762 = shalt.err (!%p759_p4)
}
   0xe   :  { %39 = dma.hbm_to_vmem [thread:$0]  %s958_s1, 64, %s37_s25, [#allocation6]  }
   0xf   :  { %s771_s8 = scalar_lea.vmem %s24_s27, 512  ;;  %p776_p6 = scmp.lt.s32.totalorder %s24_s27, %s24_s27 }
  0x10   :  { %p772_p5 = scmp.ne.s32.totalorder %s24_s27, %s771_s8  ;;  %p777_p7 = scmp.lt.s32.totalorder %s771_s8, %s771_s8 }
  0x12   :  { %p778_p8 = por %p777_p7, %p776_p6 }
  0x14   :  { %p779_p9 = pnand %p778_p8, %p772_p5 }
  0x16   :  { %782 = shalt.err (!%p779_p9)
}
  0x17   :  { %s875_s9 = smov 256   ;;  %s876_s10 = smov 16  }
  0x18   :  { %29 = dma.hbm_to_vmem [thread:$0]  %s957_s0, 512, %s24_s27, [#allocation3], %s875_s9, %s875_s9, %s876_s10  }
  0x19   :  { %s877_s13 = smov [#allocation7]  }
  0x1a   :  { %s45_s14 = sshll.u32 %s877_s13, 4  ;;  %s46_s14 = int_to_ptr.vmem [resolvable:$true] %s45_s14 }
  0x1b   :  { %s791_s15 = scalar_lea.vmem %s46_s14, 8192  ;;  %p796_p11 = scmp.lt.s32.totalorder %s46_s14, %s46_s14 }
  0x1c   :  { %p792_p10 = scmp.ne.s32.totalorder %s46_s14, %s791_s15  ;;  %p797_p12 = scmp.lt.s32.totalorder %s791_s15, %s791_s15 }
  0x1e   :  { %p798_p13 = por %p797_p12, %p796_p11 }
  0x20   :  { %p799_p0 = pnand %p798_p13, %p792_p10 }
  0x22   :  { %802 = shalt.err (!%p799_p0)
}
  0x23   :  { %s878_s1 = smov 128   ;;  %s879_s16 = smov 8  }
  0x24   :  { %51 = dma.hbm_to_vmem [thread:$0]  %s959_s2, 8192, %s46_s14, [#allocation6], %s878_s1, %s878_s1, %s879_s16  }
  0x25   :  { %s880_s0 = smov [#allocation8]  }
  0x26   :  { %s59_s19 = sshll.u32 %s880_s0, 4  ;;  %s60_s19 = int_to_ptr.vmem [resolvable:$true] %s59_s19 }
  0x27   :  { %s811_s20 = scalar_lea.vmem %s60_s19, 8192  ;;  %p816_p2 = scmp.lt.s32.totalorder %s60_s19, %s60_s19 }
  0x28   :  { %p812_p1 = scmp.ne.s32.totalorder %s60_s19, %s811_s20  ;;  %p817_p3 = scmp.lt.s32.totalorder %s811_s20, %s811_s20 }
  0x2a   :  { %p818_p4 = por %p817_p3, %p816_p2 }
  0x2c   :  { %p819_p5 = pnand %p818_p4, %p812_p1 }
  0x2e   :  { %822 = shalt.err (!%p819_p5)
}
  0x2f   :  { %65 = dma.hbm_to_vmem [thread:$0]  %s961_s4, 8192, %s60_s19, [#allocation9], %s878_s1, %s878_s1, %s879_s16  }
  0x30   :  { %863 = dma.done.wait [#allocation3], 512  }
  0x31   :  { %864 = vsyncadd [#allocation3], 4294966784 }
  0x32   :  { %865 = dma.done.wait [#allocation6], 8256  }
  0x33   :  { %866 = vsyncadd [#allocation6], 4294959040 }
  0x34   :  { %867 = dma.done.wait [#allocation9], 8192  }
  0x35   :  { %868 = vsyncadd [#allocation9], 4294959104  ;;  %v123_v0 = vld [vmem:[#allocation7 + $0xf8] sm:$0xff]  ;;  %v122_v4 = vld [vmem:[#allocation7 + $0xf0] sm:$0xff]  ;;  %s882_s23 = smov [#allocation10]  }
  0x36   :  { %v155_v1 = vld [vmem:[#allocation7 + $0x1f8] sm:$0xff]  ;;  %586 = vmatprep.subr.mxu0 %v123_v0  ;;  %v154_v5 = vld [vmem:[#allocation7 + $0x1f0] sm:$0xff]  ;;  %v121_v8 = vld [vmem:[#allocation7 + $0xe8] sm:$0xff]  ;;  %s556_s24 = sshll.u32 %s882_s23, 4  ;;  %s557_s24 = int_to_ptr.vmem [resolvable:$true] %s556_s24 }
  0x37   :  { %v107_v2 = vld [vmem:[#allocation7 + $0x78] sm:$0xff]  ;;  %624 = vmatprep.subr.mxu1 %v155_v1  ;;  %v106_v6 = vld [vmem:[#allocation7 + $0x70] sm:$0xff]  ;;  %v153_v9 = vld [vmem:[#allocation7 + $0x1e8] sm:$0xff]  ;;  %s823_s26 = scalar_lea.vmem %s557_s24, 256  ;;  %p828_p7 = scmp.lt.s32.totalorder %s557_s24, %s557_s24 }
  0x38   :  { %v139_v3 = vld [vmem:[#allocation7 + $0x178] sm:$0xff]  ;;  %587 = vmatpush3.msra.mxu0 %v107_v2  ;;  %v138_v7 = vld [vmem:[#allocation7 + $0x170] sm:$0xff]  ;;  %v105_v10 = vld [vmem:[#allocation7 + $0x68] sm:$0xff]  ;;  %p824_p6 = scmp.ne.s32.totalorder %s557_s24, %s823_s26  ;;  %p829_p8 = scmp.lt.s32.totalorder %s823_s26, %s823_s26 }
  0x39   :  { %625 = vmatpush3.msra.mxu1 %v139_v3  ;;  %588 = vmatprep.subr.mxu0 %v122_v4  ;;  %v137_v11 = vld [vmem:[#allocation7 + $0x168] sm:$0xff]  ;;  %v120_v12 = vld [vmem:[#allocation7 + $0xe0] sm:$0xff]  ;;  %v119_v16 = vld [vmem:[#allocation7 + $0xd8] sm:$0xff] }
  0x3a   :  { %626 = vmatprep.subr.mxu1 %v154_v5  ;;  %589 = vmatpush3.msra.mxu0 %v106_v6  ;;  %v152_v13 = vld [vmem:[#allocation7 + $0x1e0] sm:$0xff]  ;;  %v151_v17 = vld [vmem:[#allocation7 + $0x1d8] sm:$0xff]  ;;  %v118_v20 = vld [vmem:[#allocation7 + $0xd0] sm:$0xff]  ;;  %p830_p9 = por %p829_p8, %p828_p7 }
  0x3b   :  { %627 = vmatpush3.msra.mxu1 %v138_v7  ;;  %590 = vmatprep.subr.mxu0 %v121_v8  ;;  %v104_v14 = vld [vmem:[#allocation7 + $0x60] sm:$0xff]  ;;  %v103_v18 = vld [vmem:[#allocation7 + $0x58] sm:$0xff]  ;;  %v150_v21 = vld [vmem:[#allocation7 + $0x1d0] sm:$0xff] }
  0x3c   :  { %628 = vmatprep.subr.mxu1 %v153_v9  ;;  %v136_v15 = vld [vmem:[#allocation7 + $0x160] sm:$0xff]  ;;  %591 = vmatpush3.msra.mxu0 %v105_v10  ;;  %v135_v19 = vld [vmem:[#allocation7 + $0x158] sm:$0xff]  ;;  %v102_v22 = vld [vmem:[#allocation7 + $0x50] sm:$0xff]  ;;  %p831_p10 = pnand %p830_p9, %p824_p6 }
  0x3d   :  { %629 = vmatpush3.msra.mxu1 %v137_v11  ;;  %592 = vmatprep.subr.mxu0 %v120_v12  ;;  %v134_v23 = vld [vmem:[#allocation7 + $0x150] sm:$0xff]  ;;  %v117_v24 = vld [vmem:[#allocation7 + $0xc8] sm:$0xff]  ;;  %v116_v28 = vld [vmem:[#allocation7 + $0xc0] sm:$0xff] }
  0x3e   :  { %630 = vmatprep.subr.mxu1 %v152_v13  ;;  %593 = vmatpush3.msra.mxu0 %v104_v14  ;;  %v149_v25 = vld [vmem:[#allocation7 + $0x1c8] sm:$0xff]  ;;  %v148_v29 = vld [vmem:[#allocation7 + $0x1c0] sm:$0xff]  ;;  %v115_v32 = vld [vmem:[#allocation7 + $0xb8] sm:$0xff] }
  0x3f   :  { %631 = vmatpush3.msra.mxu1 %v136_v15  ;;  %594 = vmatprep.subr.mxu0 %v119_v16  ;;  %v101_v26 = vld [vmem:[#allocation7 + $0x48] sm:$0xff]  ;;  %v100_v30 = vld [vmem:[#allocation7 + $0x40] sm:$0xff]  ;;  %v147_v33 = vld [vmem:[#allocation7 + $0x1b8] sm:$0xff] }
  0x40   :  { %632 = vmatprep.subr.mxu1 %v151_v17  ;;  %595 = vmatpush3.msra.mxu0 %v103_v18  ;;  %v133_v27 = vld [vmem:[#allocation7 + $0x148] sm:$0xff]  ;;  %v132_v31 = vld [vmem:[#allocation7 + $0x140] sm:$0xff]  ;;  %v99_v34 = vld [vmem:[#allocation7 + $0x38] sm:$0xff] }
  0x41   :  { %633 = vmatpush3.msra.mxu1 %v135_v19  ;;  %596 = vmatprep.subr.mxu0 %v118_v20  ;;  %v131_v35 = vld [vmem:[#allocation7 + $0x138] sm:$0xff]  ;;  %v114_v36 = vld [vmem:[#allocation7 + $0xb0] sm:$0xff]  ;;  %v113_v40 = vld [vmem:[#allocation7 + $0xa8] sm:$0xff] }
  0x42   :  { %634 = vmatprep.subr.mxu1 %v150_v21  ;;  %597 = vmatpush3.msra.mxu0 %v102_v22  ;;  %v146_v37 = vld [vmem:[#allocation7 + $0x1b0] sm:$0xff]  ;;  %v145_v41 = vld [vmem:[#allocation7 + $0x1a8] sm:$0xff]  ;;  %v112_v44 = vld [vmem:[#allocation7 + $0xa0] sm:$0xff] }
  0x43   :  { %635 = vmatpush3.msra.mxu1 %v134_v23  ;;  %598 = vmatprep.subr.mxu0 %v117_v24  ;;  %v98_v38 = vld [vmem:[#allocation7 + $0x30] sm:$0xff]  ;;  %v97_v42 = vld [vmem:[#allocation7 + $0x28] sm:$0xff]  ;;  %v144_v45 = vld [vmem:[#allocation7 + $0x1a0] sm:$0xff] }
  0x44   :  { %636 = vmatprep.subr.mxu1 %v149_v25  ;;  %599 = vmatpush3.msra.mxu0 %v101_v26  ;;  %v130_v39 = vld [vmem:[#allocation7 + $0x130] sm:$0xff]  ;;  %v129_v43 = vld [vmem:[#allocation7 + $0x128] sm:$0xff]  ;;  %v96_v46 = vld [vmem:[#allocation7 + $0x20] sm:$0xff] }
  0x45   :  { %637 = vmatpush3.msra.mxu1 %v133_v27  ;;  %600 = vmatprep.subr.mxu0 %v116_v28  ;;  %v128_v47 = vld [vmem:[#allocation7 + $0x120] sm:$0xff]  ;;  %v111_v48 = vld [vmem:[#allocation7 + $0x98] sm:$0xff]  ;;  %v110_v52 = vld [vmem:[#allocation7 + $0x90] sm:$0xff] }
  0x46   :  { %638 = vmatprep.subr.mxu1 %v148_v29  ;;  %601 = vmatpush3.msra.mxu0 %v100_v30  ;;  %v143_v49 = vld [vmem:[#allocation7 + $0x198] sm:$0xff]  ;;  %v142_v53 = vld [vmem:[#allocation7 + $0x190] sm:$0xff]  ;;  %v109_v57 = vld [vmem:[#allocation7 + $0x88] sm:$0xff] }
  0x47   :  { %639 = vmatpush3.msra.mxu1 %v132_v31  ;;  %602 = vmatprep.subr.mxu0 %v115_v32  ;;  %v95_v50 = vld [vmem:[#allocation7 + $0x18] sm:$0xff]  ;;  %v94_v54 = vld [vmem:[#allocation7 + $0x10] sm:$0xff]  ;;  %v141_v58 = vld [vmem:[#allocation7 + $0x188] sm:$0xff] }
  0x48   :  { %640 = vmatprep.subr.mxu1 %v147_v33  ;;  %603 = vmatpush3.msra.mxu0 %v99_v34  ;;  %v127_v51 = vld [vmem:[#allocation7 + $0x118] sm:$0xff]  ;;  %v126_v55 = vld [vmem:[#allocation7 + $0x110] sm:$0xff]  ;;  %v93_v59 = vld [vmem:[#allocation7 + $0x8] sm:$0xff] }
  0x49   :  { %641 = vmatpush3.msra.mxu1 %v131_v35  ;;  %604 = vmatprep.subr.mxu0 %v114_v36  ;;  %v80_v56 = vld [vmem:[#allocation2] sm:$0xff]  ;;  %v125_v60 = vld [vmem:[#allocation7 + $0x108] sm:$0xff]  ;;  %v347_v10 = vld [vmem:[#allocation8 + $0xf0] sm:$0xff] }
  0x4a   :  { %642 = vmatprep.subr.mxu1 %v146_v37  ;;  %605 = vmatpush3.msra.mxu0 %v98_v38  ;;  %v81_v61 = vld [vmem:[#allocation2 + $0x8] sm:$0xff]  ;;  %v85_v0 = vunpack.c.h.bf16 %v80_v56  ;;  %v84_v2 = vunpack.c.l.bf16 %v80_v56  ;;  %v348_v6 = vld [vmem:[#allocation8 + $0xf8] sm:$0xff]  ;;  %v379_v11 = vld [vmem:[#allocation8 + $0x1f0] sm:$0xff] }
  0x4b   :  { %643 = vmatpush3.msra.mxu1 %v130_v39  ;;  %606 = vmatprep.subr.mxu0 %v113_v40  ;;  %v108_v62 = vld [vmem:[#allocation7 + $0x80] sm:$0xff]  ;;  %v87_v4 = vunpack.c.h.bf16 %v81_v61  ;;  %v86_v5 = vunpack.c.l.bf16 %v81_v61  ;;  %v380_v7 = vld [vmem:[#allocation8 + $0x1f8] sm:$0xff]  ;;  %v331_v12 = vld [vmem:[#allocation8 + $0x70] sm:$0xff]  ;;  %v881_v40 = vmov 1983009808  }
  0x4c   :  { %644 = vmatprep.subr.mxu1 %v145_v41  ;;  %607 = vmatpush3.msra.mxu0 %v97_v42  ;;  %v140_v63 = vld [vmem:[#allocation7 + $0x180] sm:$0xff]  ;;  %v332_v8 = vld [vmem:[#allocation8 + $0x78] sm:$0xff]  ;;  %v363_v13 = vld [vmem:[#allocation8 + $0x170] sm:$0xff]  ;;  %v391_v41 = vunpack.c.l.s4 %v881_v40  ;;  %v393_v42 = vlaneseq }
  0x4d   :  { %645 = vmatpush3.msra.mxu1 %v129_v43  ;;  %608 = vmatprep.subr.mxu0 %v112_v44  ;;  %v92_v1 = vld [vmem:[#allocation7] sm:$0xff]  ;;  %v364_v9 = vld [vmem:[#allocation8 + $0x178] sm:$0xff]  ;;  %v346_v14 = vld [vmem:[#allocation8 + $0xe8] sm:$0xff] }
  0x4e   :  { %646 = vmatprep.subr.mxu1 %v144_v45  ;;  %609 = vmatpush3.msra.mxu0 %v96_v46  ;;  %v124_v3 = vld [vmem:[#allocation7 + $0x100] sm:$0xff]  ;;  %v378_v15 = vld [vmem:[#allocation8 + $0x1e8] sm:$0xff]  ;;  %v344_v22 = vld [vmem:[#allocation8 + $0xd8] sm:$0xff] }
  0x4f   :  { %647 = vmatpush3.msra.mxu1 %v128_v47  ;;  %610 = vmatprep.subr.mxu0 %v111_v48  ;;  %v330_v16 = vld [vmem:[#allocation8 + $0x68] sm:$0xff]  ;;  %v345_v18 = vld [vmem:[#allocation8 + $0xe0] sm:$0xff]  ;;  %v376_v23 = vld [vmem:[#allocation8 + $0x1d8] sm:$0xff] }
  0x50   :  { %648 = vmatprep.subr.mxu1 %v143_v49  ;;  %611 = vmatpush3.msra.mxu0 %v95_v50  ;;  %v362_v17 = vld [vmem:[#allocation8 + $0x168] sm:$0xff]  ;;  %v377_v19 = vld [vmem:[#allocation8 + $0x1e0] sm:$0xff]  ;;  %v328_v24 = vld [vmem:[#allocation8 + $0x58] sm:$0xff] }
  0x51   :  { %649 = vmatpush3.msra.mxu1 %v127_v51  ;;  %612 = vmatprep.subr.mxu0 %v110_v52  ;;  %v329_v20 = vld [vmem:[#allocation8 + $0x60] sm:$0xff]  ;;  %v360_v25 = vld [vmem:[#allocation8 + $0x158] sm:$0xff]  ;;  %v343_v26 = vld [vmem:[#allocation8 + $0xd0] sm:$0xff]  ;;  %v392_v52 = vunpack.c.0.s8 %v391_v41 }
  0x52   :  { %650 = vmatprep.subr.mxu1 %v142_v53  ;;  %613 = vmatpush3.msra.mxu0 %v94_v54  ;;  %v361_v21 = vld [vmem:[#allocation8 + $0x160] sm:$0xff]  ;;  %v375_v27 = vld [vmem:[#allocation8 + $0x1d0] sm:$0xff]  ;;  %v342_v30 = vld [vmem:[#allocation8 + $0xc8] sm:$0xff]  ;;  %v394_v53 = vshrl.u32 %v393_v42, 7 }
  0x53   :  { %651 = vmatpush3.msra.mxu1 %v126_v55  ;;  %614 = vmatprep.subr.mxu0 %v109_v57  ;;  %v327_v28 = vld [vmem:[#allocation8 + $0x50] sm:$0xff]  ;;  %v374_v31 = vld [vmem:[#allocation8 + $0x1c8] sm:$0xff]  ;;  %v341_v34 = vld [vmem:[#allocation8 + $0xc0] sm:$0xff] }
  0x54   :  { %652 = vmatprep.subr.mxu1 %v141_v58  ;;  %615 = vmatpush3.msra.mxu0 %v93_v59  ;;  %v359_v29 = vld [vmem:[#allocation8 + $0x150] sm:$0xff]  ;;  %v326_v32 = vld [vmem:[#allocation8 + $0x48] sm:$0xff]  ;;  %v373_v35 = vld [vmem:[#allocation8 + $0x1c0] sm:$0xff] }
  0x55   :  { %653 = vmatpush3.msra.mxu1 %v125_v60  ;;  %616 = vmatprep.subr.mxu0 %v108_v62  ;;  %v358_v33 = vld [vmem:[#allocation8 + $0x148] sm:$0xff]  ;;  %v325_v36 = vld [vmem:[#allocation8 + $0x40] sm:$0xff]  ;;  %v340_v38 = vld [vmem:[#allocation8 + $0xb8] sm:$0xff] }
  0x56   :  { %654 = vmatprep.subr.mxu1 %v140_v63  ;;  %617 = vmatpush3.msra.mxu0 %v92_v1  ;;  %v357_v37 = vld [vmem:[#allocation8 + $0x140] sm:$0xff]  ;;  %v372_v39 = vld [vmem:[#allocation8 + $0x1b8] sm:$0xff]  ;;  %v339_v45 = vld [vmem:[#allocation8 + $0xb0] sm:$0xff] }
  0x57   :  { %227 = vmatprep.mubr.f32.mxu0 %v85_v0  ;;  %655 = vmatpush3.msra.mxu1 %v124_v3  ;;  %v324_v43 = vld [vmem:[#allocation8 + $0x38] sm:$0xff]  ;;  %v371_v46 = vld [vmem:[#allocation8 + $0x1b0] sm:$0xff]  ;;  %v338_v50 = vld [vmem:[#allocation8 + $0xa8] sm:$0xff] }
  0x58   :  { %228 = vmatmul.mubr.f32.vlgmr.msra.gmra.mxu0 %v84_v2  ;;  %302 = vmatprep.mubr.f32.mxu1 %v87_v4  ;;  %v356_v44 = vld [vmem:[#allocation8 + $0x138] sm:$0xff]  ;;  %v323_v48 = vld [vmem:[#allocation8 + $0x30] sm:$0xff]  ;;  %v370_v51 = vld [vmem:[#allocation8 + $0x1a8] sm:$0xff]  ;;  %v395_v2 = vsub.s32 %v392_v52, %v394_v53 }
  0x59   :  { %662 = vmatprep.subr.mxu0 %v348_v6  ;;  %697 = vmatprep.subr.mxu1 %v380_v7  ;;  %v315_v47 = vld [vmem:[#allocation5] sm:$0xf]  ;;  %v355_v49 = vld [vmem:[#allocation8 + $0x130] sm:$0xff]  ;;  %v322_v54 = vld [vmem:[#allocation8 + $0x28] sm:$0xff] }
  0x5a   :  { %303 = vmatmul.mubr.f32.vlgmr.msra.gmra.mxu1 %v86_v5  ;;  %663 = vmatpush3.msra.mxu0 %v332_v8  ;;  %v354_v55 = vld [vmem:[#allocation8 + $0x128] sm:$0xff]  ;;  %v316_v57 = vunpack.c.l.bf16 %v315_v47  ;;  %v337_v58 = vld [vmem:[#allocation8 + $0xa0] sm:$0xff]  ;;  %v336_v62 = vld [vmem:[#allocation8 + $0x98] sm:$0xff] }
  0x5b   :  { %698 = vmatpush3.msra.mxu1 %v364_v9  ;;  %664 = vmatprep.subr.mxu0 %v347_v10  ;;  %v82_v56 = vld [vmem:[#allocation2 + $0x10] sm:$0xff]  ;;  %v369_v59 = vld [vmem:[#allocation8 + $0x1a0] sm:$0xff]  ;;  %v368_v63 = vld [vmem:[#allocation8 + $0x198] sm:$0xff] }
  0x5c   :  { %699 = vmatprep.subr.mxu1 %v379_v11  ;;  %665 = vmatpush3.msra.mxu0 %v331_v12  ;;  %v321_v60 = vld [vmem:[#allocation8 + $0x20] sm:$0xff]  ;;  %v89_v0 = vunpack.c.h.bf16 %v82_v56  ;;  %v83_v1 = vld [vmem:[#allocation2 + $0x18] sm:$0xff]  ;;  %v88_v4 = vunpack.c.l.bf16 %v82_v56  ;;  %v389_v5 = vcombine.high %v316_v57, %v316_v57  ;;  %v396_v11 = vrot.slane %v316_v57, %v395_v2 }
  0x5d   :  { %700 = vmatpush3.msra.mxu1 %v363_v13  ;;  %666 = vmatprep.subr.mxu0 %v346_v14  ;;  %v353_v61 = vld [vmem:[#allocation8 + $0x120] sm:$0xff]  ;;  %v320_v3 = vld [vmem:[#allocation8 + $0x18] sm:$0xff]  ;;  %v335_v7 = vld [vmem:[#allocation8 + $0x90] sm:$0xff]  ;;  %v91_v9 = vunpack.c.h.bf16 %v83_v1  ;;  %v90_v13 = vunpack.c.l.bf16 %v83_v1 }
  0x5e   :  { %701 = vmatprep.subr.mxu1 %v378_v15  ;;  %667 = vmatpush3.msra.mxu0 %v330_v16  ;;  %v352_v6 = vld [vmem:[#allocation8 + $0x118] sm:$0xff]  ;;  %v367_v8 = vld [vmem:[#allocation8 + $0x190] sm:$0xff]  ;;  %v334_v14 = vld [vmem:[#allocation8 + $0x88] sm:$0xff]  ;;  %v403_v15 = vrot.slane %v389_v5, %v395_v2 }
  0x5f   :  { %702 = vmatpush3.msra.mxu1 %v362_v17  ;;  %668 = vmatprep.subr.mxu0 %v345_v18  ;;  %v319_v10 = vld [vmem:[#allocation8 + $0x10] sm:$0xff]  ;;  %v366_v16 = vld [vmem:[#allocation8 + $0x188] sm:$0xff] }
  0x60   :  { %703 = vmatprep.subr.mxu1 %v377_v19  ;;  %669 = vmatpush3.msra.mxu0 %v329_v20  ;;  %v351_v12 = vld [vmem:[#allocation8 + $0x110] sm:$0xff]  ;;  %v318_v17 = vld [vmem:[#allocation8 + $0x8] sm:$0xff]  ;;  %v333_v19 = vld [vmem:[#allocation8 + $0x80] sm:$0xff] }
  0x61   :  { %704 = vmatpush3.msra.mxu1 %v361_v21  ;;  %670 = vmatprep.subr.mxu0 %v344_v22  ;;  %v350_v18 = vld [vmem:[#allocation8 + $0x108] sm:$0xff]  ;;  %v365_v20 = vld [vmem:[#allocation8 + $0x180] sm:$0xff]  ;;  %v404_v21 = vcombine.high %v396_v11, %v396_v11 }
  0x62   :  { %705 = vmatprep.subr.mxu1 %v376_v23  ;;  %671 = vmatpush3.msra.mxu0 %v328_v24  ;;  %v317_v22 = vld [vmem:[#allocation8] sm:$0xff]  ;;  %v405_v23 = vcombine.high %v403_v15, %v403_v15 }
  0x63   :  { %706 = vmatpush3.msra.mxu1 %v360_v25  ;;  %672 = vmatprep.subr.mxu0 %v343_v26  ;;  %v349_v24 = vld [vmem:[#allocation8 + $0x100] sm:$0xff] }
  0x64   :  { %707 = vmatprep.subr.mxu1 %v375_v27  ;;  %673 = vmatpush3.msra.mxu0 %v327_v28  ;;  %v584_v27 = vld [vmem:[%s960_s3] ss:$0 sm:$0xff] }
  0x65   :  { %708 = vmatpush3.msra.mxu1 %v359_v29  ;;  %674 = vmatprep.subr.mxu0 %v342_v30 }
  0x66   :  { %709 = vmatprep.subr.mxu1 %v374_v31  ;;  %675 = vmatpush3.msra.mxu0 %v326_v32 }
  0x67   :  { %710 = vmatpush3.msra.mxu1 %v358_v33  ;;  %676 = vmatprep.subr.mxu0 %v341_v34 }
  0x68   :  { %711 = vmatprep.subr.mxu1 %v373_v35  ;;  %677 = vmatpush3.msra.mxu0 %v325_v36 }
  0x69   :  { %712 = vmatpush3.msra.mxu1 %v357_v37  ;;  %678 = vmatprep.subr.mxu0 %v340_v38 }
  0x6a   :  { %713 = vmatprep.subr.mxu1 %v372_v39  ;;  %679 = vmatpush3.msra.mxu0 %v324_v43 }
  0x6b   :  { %714 = vmatpush3.msra.mxu1 %v356_v44  ;;  %680 = vmatprep.subr.mxu0 %v339_v45  ;;  %v585_v44 = vld [vmem:[%s962_s5] ss:$0 sm:$0xff] }
  0x6c   :  { %715 = vmatprep.subr.mxu1 %v371_v46  ;;  %681 = vmatpush3.msra.mxu0 %v323_v48 }
  0x6d   :  { %716 = vmatpush3.msra.mxu1 %v355_v49  ;;  %682 = vmatprep.subr.mxu0 %v338_v50 }
  0x6e   :  { %717 = vmatprep.subr.mxu1 %v370_v51  ;;  %683 = vmatpush3.msra.mxu0 %v322_v54 }
  0x6f   :  { %718 = vmatpush3.msra.mxu1 %v354_v55  ;;  %684 = vmatprep.subr.mxu0 %v337_v58 }
  0x70   :  { %719 = vmatprep.subr.mxu1 %v369_v59  ;;  %685 = vmatpush3.msra.mxu0 %v321_v60 }
  0x71   :  { %720 = vmatpush3.msra.mxu1 %v353_v61  ;;  %686 = vmatprep.subr.mxu0 %v336_v62 }
  0x72   :  { %721 = vmatprep.subr.mxu1 %v368_v63  ;;  %232 = vmatprep.mubr.f32.mxu0 %v89_v0 }
  0x73   :  { %687 = vmatpush3.msra.mxu0 %v320_v3  ;;  %722 = vmatpush3.msra.mxu1 %v352_v6 }
  0x74   :  { %233 = vmatmul.mubr.f32.gmra.mxu0 %v88_v4  ;;  %688 = vmatprep.subr.mxu0 %v335_v7 }
  0x75   :  { %723 = vmatprep.subr.mxu1 %v367_v8  ;;  %307 = vmatprep.mubr.f32.mxu1 %v91_v9 }
  0x76   :  { %689 = vmatpush3.msra.mxu0 %v319_v10  ;;  %724 = vmatpush3.msra.mxu1 %v351_v12 }
  0x77   :  { %690 = vmatprep.subr.mxu0 %v334_v14  ;;  %308 = vmatmul.mubr.f32.gmra.mxu1 %v90_v13 }
  0x78   :  { %725 = vmatprep.subr.mxu1 %v366_v16  ;;  %691 = vmatpush3.msra.mxu0 %v318_v17 }
  0x79   :  { %726 = vmatpush3.msra.mxu1 %v350_v18  ;;  %692 = vmatprep.subr.mxu0 %v333_v19 }
  0x7a   :  { %727 = vmatprep.subr.mxu1 %v365_v20  ;;  %693 = vmatpush3.msra.mxu0 %v317_v22 }
  0x7b   :  { %474 = vmatprep.mubr.f32.mxu0 %v404_v21  ;;  %728 = vmatpush3.msra.mxu1 %v349_v24 }
  0x7c   :  { %544 = vmatprep.mubr.f32.mxu1 %v405_v23  ;;  %475 = vmatmul.mubr.f32.vlgmr.msra.gmra.mxu0 %v396_v11 }
  0x7d   :  { %545 = vmatmul.mubr.f32.vlgmr.msra.gmra.mxu1 %v403_v15 }
 0x118   :  { %v618_v25 = vpop.f32.mrf.mxu0 }
 0x11a   :  { %v656_v26 = vpop.f32.mrf.mxu1  ;;  %v619_v28 = vpop.f32.mrf.mxu0 }
 0x11b   :  { %v620_v29 = vadd.f32 %v619_v28, %v618_v25 }
 0x11c   :  { %v657_v30 = vpop.f32.mrf.mxu1 }
 0x11d   :  { %v230_v31 = vadd.f32 %v620_v29, %v584_v27  ;;  %v658_v32 = vadd.f32 %v657_v30, %v656_v26 }
 0x11f   :  { %v305_v33 = vadd.f32 %v658_v32, %v230_v31 }
 0x121   :  { %313 = vst [vmem:[#allocation10] sm:$0xff] %v305_v33 }
 0x134   :  { %v621_v34 = vpop.f32.mrf.mxu0 }
 0x136   :  { %v622_v35 = vpop.f32.mrf.mxu0 }
 0x137   :  { %v623_v36 = vadd.f32 %v622_v35, %v621_v34  ;;  %v659_v37 = vpop.f32.mrf.mxu1 }
 0x139   :  { %v235_v38 = vadd.f32 %v623_v36, %v584_v27  ;;  %v660_v39 = vpop.f32.mrf.mxu1 }
 0x13a   :  { %v661_v40 = vadd.f32 %v660_v39, %v659_v37 }
 0x13c   :  { %v310_v41 = vadd.f32 %v661_v40, %v235_v38  ;;  %v694_v42 = vpop.f32.mrf.mxu0 }
 0x13d   :  { %v729_v43 = vpop.f32.mrf.mxu1 }
 0x13e   :  { %314 = vst [vmem:[#allocation10 + $0x8] sm:$0xff] %v310_v41  ;;  %v695_v45 = vpop.f32.mrf.mxu0 }
 0x13f   :  { %v730_v46 = vpop.f32.mrf.mxu1  ;;  %v696_v47 = vadd.f32 %v695_v45, %v694_v42 }
 0x140   :  { %834 = shalt.err (!%p831_p10)
}
 0x141   :  { %562 = dma.vmem_to_hbm [thread:$0]  %s557_s24, 256, %s963_s6, [#allocation4], %s878_s1, %s878_s1, %s879_s16   ;;  %v477_v48 = vadd.f32 %v696_v47, %v585_v44  ;;  %v731_v49 = vadd.f32 %v730_v46, %v729_v43 }
 0x142   :  { %s883_s29 = smov [#allocation11]  }
 0x143   :  { %s569_s30 = sshll.u32 %s883_s29, 4  ;;  %v547_v50 = vadd.f32 %v731_v49, %v477_v48  ;;  %s570_s30 = int_to_ptr.vmem [resolvable:$true] %s569_s30 }
 0x144   :  { %s843_s5 = scalar_lea.vmem %s570_s30, 32  ;;  %p848_p12 = scmp.lt.s32.totalorder %s570_s30, %s570_s30 }
 0x145   :  { %550 = vst [vmem:[#allocation11] sm:$0x3] %v547_v50  ;;  %p844_p11 = scmp.ne.s32.totalorder %s570_s30, %s843_s5  ;;  %p849_p13 = scmp.lt.s32.totalorder %s843_s5, %s843_s5 }
 0x147   :  { %p850_p0 = por %p849_p13, %p848_p12 }
 0x149   :  { %p851_p1 = pnand %p850_p0, %p844_p11 }
 0x14b   :  { %854 = shalt.err (!%p851_p1)
}
 0x14c   :  { %572 = dma.vmem_to_hbm [thread:$0]  %s570_s30, 32, %s964_s7, [#allocation12]  }
 0x14d   :  { %869 = dma.done.wait [#allocation4], 256  }
 0x14e   :  { %870 = vsyncadd [#allocation4], 4294967040 }
 0x14f   :  { %871 = dma.done.wait [#allocation12], 32  }
 0x150   :  { %872 = vsyncadd [#allocation12], 4294967264 }
 0x151   :  { %579 = vsyncpa [#allocation3], 1 }
 0x152   :  { %580 = vsyncpa [#allocation6], 1 }
 0x153   :  { %581 = vsyncpa [#allocation9], 1 }
 0x154   :  { %582 = vsyncpa [#allocation4], 1 }
 0x155   :  { %583 = vsyncpa [#allocation12], 1 }

</bundles_post_ra>
